<compile_context>
chip_gen: v7x
topology: tpu7x:2x2x1
jax: 0.10.0
libtpu: 0.0.40
codegen_flags: <defaults>
</compile_context>

<pallas_src>
import functools

import jax
import jax.numpy as jnp
from jax.experimental import pallas as pl
from jax.experimental.pallas import tpu as pltpu


def _round_up(a: int, b: int) -> int:
    return (a + b - 1) // b * b


def _vmem_budget():
    """(scratch budget bytes, vmem_limit bytes), per TPU generation."""
    try:
        cap = pltpu.get_tpu_info().vmem_capacity_bytes
    except Exception:
        cap = 64 * 1024 * 1024  # conservative fallback (v7x-sized)
    if cap >= 100 * 1024 * 1024:                     # v5e / v6e: 128 MiB VMEM
        return 48 * 1024 * 1024, 96 * 1024 * 1024
    return 24 * 1024 * 1024, 44 * 1024 * 1024        # v7x: 64 MiB per TensorCore


# ----------------------------------------------------------------------------
# Small-image fast path: everything VMEM-resident, single shot, no grid.
# ----------------------------------------------------------------------------
def _corr2d_small_kernel(bias_ref, w_ref, x_ref, o_ref, *, kh, kw, oh, ow):
    bias_val = bias_ref[0]
    acc = jnp.full((oh, ow), bias_val, dtype=jnp.float32)
    for dj in range(kw):
        col = x_ref[:, dj:dj + ow]               # one lane-shifted window per dj
        for di in range(kh):
            acc = acc + w_ref[di, dj] * col[di:di + oh, :]
    o_ref[...] = acc


# ----------------------------------------------------------------------------
# Tiled path: HBM-resident input, haloed row tiles, double-buffered manual DMA,
# 2-way parallel outer grid axis for megacore (v7x).
# ----------------------------------------------------------------------------
def _corr2d_tiled_kernel(bias_ref, w_ref, x_hbm, o_ref, buf, sem, *,
                         kh, kw, tile_h, sub_h, ow_pad, in_rows,
                         tiles_per_core):
    c = pl.program_id(0)                 # core-split index (parallel)
    t = pl.program_id(1)                 # per-core tile index (arbitrary)
    n_inner = pl.num_programs(1)
    slot = t % 2
    base = c * tiles_per_core

    def tile_copy(tile_idx, s):
        # Haloed input slab feeding output rows [tile_idx*tile_h, +tile_h).
        return pltpu.make_async_copy(
            x_hbm.at[pl.ds(tile_idx * tile_h, in_rows), :],
            buf.at[s],
            sem.at[s],
        )

    # SMEM scalar reads hoisted ABOVE the DMA wait (.wait() breaks sst->sld
    # forwarding; this keeps the 1+KH*KW scalars off the post-wait path).
    bias_val = bias_ref[0]
    w_vals = [[w_ref[di, dj] for dj in range(kw)] for di in range(kh)]

    # Prime this core's double buffer on its first inner step.
    @pl.when(t == 0)
    def _():
        tile_copy(base, 0).start()

    # Start the NEXT tile's DMA before waiting on the current one: it targets
    # the other slot/semaphore, so it is safe and keeps the DMA engine busy.
    @pl.when(t + 1 < n_inner)
    def _():
        tile_copy(base + t + 1, 1 - slot).start()

    # Wait for this tile's slab.
    tile_copy(base + t, slot).wait()

    xv = buf.at[slot]
    n_sub = tile_h // sub_h

    # Row sub-blocks sized to stay in vregs; dj outermost so the lane-shifted
    # window is loaded once per dj and reused across all kh row offsets.
    def body(r, carry):
        row0 = pl.multiple_of(r * sub_h, sub_h)
        acc = jnp.full((sub_h, ow_pad), bias_val, dtype=jnp.float32)
        for dj in range(kw):
            col = xv[pl.ds(row0, sub_h + kh - 1), pl.ds(dj, ow_pad)]
            for di in range(kh):
                acc = acc + w_vals[di][dj] * col[di:di + sub_h, :]
        o_ref[pl.ds(row0, sub_h), :] = acc
        return carry

    jax.lax.fori_loop(0, n_sub, body, 0, unroll=(n_sub <= 4))


# ----------------------------------------------------------------------------
# Wrapper (Conv2D.forward equivalent): corr2d(x, weight) + bias
# ----------------------------------------------------------------------------
def conv2d_pallas(x, weight, bias, *, max_tile_h=512, force_tiled=False,
                  small_path_bytes=4 * 1024 * 1024):
    x = x.astype(jnp.float32)
    weight = weight.astype(jnp.float32)
    bias = bias.astype(jnp.float32)

    H, W = x.shape
    KH, KW = weight.shape
    out_h, out_w = H - KH + 1, W - KW + 1

    # Lane-dense padded output width; lane-aligned padded input width.
    ow_pad = _round_up(out_w, 128)
    xp_w = _round_up(ow_pad + KW - 1, 128)
    budget, vmem_limit = _vmem_budget()

    # ---------------- small-image single-shot fast path ----------------
    oh_pad_s = _round_up(out_h, 8)
    in_rows_s = oh_pad_s + KH - 1
    small_bytes = 4 * (oh_pad_s * ow_pad + in_rows_s * xp_w)
    if (not force_tiled) and small_bytes <= small_path_bytes:
        xp = jnp.pad(x, ((0, in_rows_s - H), (0, xp_w - W)))
        kernel = functools.partial(_corr2d_small_kernel, kh=KH, kw=KW,
                                   oh=oh_pad_s, ow=ow_pad)
        out = pl.pallas_call(
            kernel,
            out_shape=jax.ShapeDtypeStruct((oh_pad_s, ow_pad), jnp.float32),
            in_specs=[
                pl.BlockSpec(memory_space=pltpu.SMEM),   # bias (1,)
                pl.BlockSpec(memory_space=pltpu.SMEM),   # weight (KH, KW)
                pl.BlockSpec(memory_space=pltpu.VMEM),   # padded image
            ],
            out_specs=pl.BlockSpec(memory_space=pltpu.VMEM),
        )(bias, weight, xp)
        return out[:out_h, :out_w]

    # ------------------------- tiled path -------------------------
    # Row tile: largest multiple of 8 within the scratch budget
    # (2x double-buffered input slab + 2x pipelined output tile), capped.
    per_row_bytes = (2 * xp_w + 2 * ow_pad) * 4
    budget_rows = max(8, (budget // per_row_bytes) // 8 * 8)
    tile_h = min(_round_up(out_h, 8), max(8, max_tile_h // 8 * 8), budget_rows)

    n_tiles = -(-out_h // tile_h)
    n_split = 2 if n_tiles >= 2 else 1          # both TCs on v7x; harmless on 1-TC chips
    tiles_per_core = -(-n_tiles // n_split)
    out_h_pad = n_split * tiles_per_core * tile_h
    in_rows_tile = tile_h + KH - 1
    in_rows_total = out_h_pad + KH - 1

    # Zero-pad the image to the lane-aligned slab the kernel reads; the extra
    # rows/cols only feed padded output rows/cols that are sliced off below.
    xp = jnp.pad(x, ((0, in_rows_total - H), (0, xp_w - W)))

    # Row sub-block per fori_loop step: keep acc (sub_h x ow_pad) f32 <= 32 KiB.
    sub_h = 8
    for cand in (64, 32, 16, 8):
        if tile_h % cand == 0 and cand * ow_pad * 4 <= 32 * 1024:
            sub_h = cand
            break

    kernel = functools.partial(
        _corr2d_tiled_kernel,
        kh=KH, kw=KW, tile_h=tile_h, sub_h=sub_h, ow_pad=ow_pad,
        in_rows=in_rows_tile, tiles_per_core=tiles_per_core,
    )

    out_padded = pl.pallas_call(
        kernel,
        out_shape=jax.ShapeDtypeStruct((out_h_pad, ow_pad), jnp.float32),
        grid_spec=pltpu.PrefetchScalarGridSpec(
            num_scalar_prefetch=0,
            grid=(n_split, tiles_per_core),
            in_specs=[
                pl.BlockSpec(memory_space=pltpu.SMEM),   # bias (1,)        scalar
                pl.BlockSpec(memory_space=pltpu.SMEM),   # weight (KH, KW)  scalars
                pl.BlockSpec(memory_space=pl.ANY),       # padded image, stays in HBM
            ],
            out_specs=pl.BlockSpec(
                (tile_h, ow_pad), lambda c, t: (c * tiles_per_core + t, 0)),
            scratch_shapes=[
                pltpu.VMEM((2, in_rows_tile, xp_w), jnp.float32),  # double buffer
                pltpu.SemaphoreType.DMA((2,)),
            ],
        ),
        compiler_params=pltpu.CompilerParams(
            # Outer axis parallel (megacore split on v7x); inner axis arbitrary
            # because the manual prefetch chain carries state across it.
            dimension_semantics=("parallel", "arbitrary"),
            vmem_limit_bytes=vmem_limit,
        ),
    )(bias, weight, xp)

    return out_padded[:out_h, :out_w]


def _corr2d_ref(x, weight, bias):
    H, W = x.shape
    KH, KW = weight.shape
    oh, ow = H - KH + 1, W - KW + 1
    out = jnp.zeros((oh, ow), jnp.float32)
    for di in range(KH):
        for dj in range(KW):
            out = out + weight[di, dj] * x[di:di + oh, dj:dj + ow]
    return out + bias[0]


if __name__ == "__main__":
    key = jax.random.PRNGKey(0)
    kx1, kx2, kx3, kw = jax.random.split(key, 4)

    KH = KW = 3
    weight = jax.random.uniform(kw, (KH, KW), dtype=jnp.float32)   # torch.rand
    bias0 = jnp.zeros((1,), dtype=jnp.float32)                     # torch.zeros(1)

    # Case 1: PyTorch-example scale -> single-shot VMEM-resident fast path.
    x1 = jax.random.normal(kx1, (16, 16), dtype=jnp.float32)
    out1 = conv2d_pallas(x1, weight, bias0)
    jax.block_until_ready(out1)
    ref1 = _corr2d_ref(x1, weight, bias0)
    assert out1.shape == (14, 14)
    assert jnp.allclose(out1, ref1, atol=1e-5, rtol=1e-5)

    # Case 2: force the tiled path with tiny tiles to exercise the haloed
    # double-buffered DMA chain, the 2-way core split, and a non-zero bias.
    x2 = jax.random.normal(kx2, (34, 20), dtype=jnp.float32)
    bias1 = jnp.array([0.5], dtype=jnp.float32)
    out2 = conv2d_pallas(x2, weight, bias1, max_tile_h=8, force_tiled=True)
    jax.block_until_ready(out2)
    ref2 = _corr2d_ref(x2, weight, bias1)
    assert out2.shape == (32, 18)
    assert jnp.allclose(out2, ref2, atol=1e-5, rtol=1e-5)

    # Case 3: larger image on the tiled path (multi-tile per core, multi
    # sub-block inner loop, lane-aligned 256-wide output slab).
    x3 = jax.random.normal(kx3, (200, 150), dtype=jnp.float32)
    out3 = conv2d_pallas(x3, weight, bias1, max_tile_h=64, force_tiled=True)
    jax.block_until_ready(out3)
    ref3 = _corr2d_ref(x3, weight, bias1)
    assert out3.shape == (198, 148)
    assert jnp.allclose(out3, ref3, atol=1e-4, rtol=1e-5)

    print("KERNEL_OK")
</pallas_src>

<mosaic_0001>
module attributes {stable_mosaic.version = 11 : i64} {
  func.func @_corr2d_small_kernel(%arg0: memref<1xf32, #tpu.memory_space<smem>>, %arg1: memref<3x3xf32, #tpu.memory_space<smem>>, %arg2: memref<18x256xf32, #tpu.memory_space<vmem>>, %arg3: memref<16x128xf32, #tpu.memory_space<vmem>>) attributes {dimension_semantics = [], scalar_prefetch = 0 : i64, scratch_operands = 0 : i64, tpu.core_type = #tpu.core_type<tc>} {
    %c0 = arith.constant 0 : index
    %0 = memref.load %arg0[%c0] : memref<1xf32, #tpu.memory_space<smem>>
    %1 = vector.broadcast %0 : f32 to vector<16x128xf32>
    %c0_0 = arith.constant 0 : index
    %c0_1 = arith.constant 0 : index
    %2 = vector.load %arg2[%c0_0, %c0_1] : memref<18x256xf32, #tpu.memory_space<vmem>>, vector<18x128xf32>
    %c0_2 = arith.constant 0 : index
    %c0_3 = arith.constant 0 : index
    %3 = memref.load %arg1[%c0_2, %c0_3] : memref<3x3xf32, #tpu.memory_space<smem>>
    %4 = vector.extract_strided_slice %2 {offsets = [0, 0], sizes = [16, 128], strides = [1, 1]} : vector<18x128xf32> to vector<16x128xf32>
    %5 = vector.broadcast %3 : f32 to vector<16x128xf32>
    %6 = arith.mulf %5, %4 : vector<16x128xf32>
    %7 = arith.addf %1, %6 : vector<16x128xf32>
    %c1 = arith.constant 1 : index
    %c0_4 = arith.constant 0 : index
    %8 = memref.load %arg1[%c1, %c0_4] : memref<3x3xf32, #tpu.memory_space<smem>>
    %9 = vector.extract_strided_slice %2 {offsets = [1, 0], sizes = [16, 128], strides = [1, 1]} : vector<18x128xf32> to vector<16x128xf32>
    %10 = vector.broadcast %8 : f32 to vector<16x128xf32>
    %11 = arith.mulf %10, %9 : vector<16x128xf32>
    %12 = arith.addf %7, %11 : vector<16x128xf32>
    %c2 = arith.constant 2 : index
    %c0_5 = arith.constant 0 : index
    %13 = memref.load %arg1[%c2, %c0_5] : memref<3x3xf32, #tpu.memory_space<smem>>
    %14 = vector.extract_strided_slice %2 {offsets = [2, 0], sizes = [16, 128], strides = [1, 1]} : vector<18x128xf32> to vector<16x128xf32>
    %15 = vector.broadcast %13 : f32 to vector<16x128xf32>
    %16 = arith.mulf %15, %14 : vector<16x128xf32>
    %17 = arith.addf %12, %16 : vector<16x128xf32>
    %c0_6 = arith.constant 0 : index
    %c1_7 = arith.constant 1 : index
    %18 = vector.load %arg2[%c0_6, %c1_7] : memref<18x256xf32, #tpu.memory_space<vmem>>, vector<18x128xf32>
    %c0_8 = arith.constant 0 : index
    %c1_9 = arith.constant 1 : index
    %19 = memref.load %arg1[%c0_8, %c1_9] : memref<3x3xf32, #tpu.memory_space<smem>>
    %20 = vector.extract_strided_slice %18 {offsets = [0, 0], sizes = [16, 128], strides = [1, 1]} : vector<18x128xf32> to vector<16x128xf32>
    %21 = vector.broadcast %19 : f32 to vector<16x128xf32>
    %22 = arith.mulf %21, %20 : vector<16x128xf32>
    %23 = arith.addf %17, %22 : vector<16x128xf32>
    %c1_10 = arith.constant 1 : index
    %c1_11 = arith.constant 1 : index
    %24 = memref.load %arg1[%c1_10, %c1_11] : memref<3x3xf32, #tpu.memory_space<smem>>
    %25 = vector.extract_strided_slice %18 {offsets = [1, 0], sizes = [16, 128], strides = [1, 1]} : vector<18x128xf32> to vector<16x128xf32>
    %26 = vector.broadcast %24 : f32 to vector<16x128xf32>
    %27 = arith.mulf %26, %25 : vector<16x128xf32>
    %28 = arith.addf %23, %27 : vector<16x128xf32>
    %c2_12 = arith.constant 2 : index
    %c1_13 = arith.constant 1 : index
    %29 = memref.load %arg1[%c2_12, %c1_13] : memref<3x3xf32, #tpu.memory_space<smem>>
    %30 = vector.extract_strided_slice %18 {offsets = [2, 0], sizes = [16, 128], strides = [1, 1]} : vector<18x128xf32> to vector<16x128xf32>
    %31 = vector.broadcast %29 : f32 to vector<16x128xf32>
    %32 = arith.mulf %31, %30 : vector<16x128xf32>
    %33 = arith.addf %28, %32 : vector<16x128xf32>
    %c0_14 = arith.constant 0 : index
    %c2_15 = arith.constant 2 : index
    %34 = vector.load %arg2[%c0_14, %c2_15] : memref<18x256xf32, #tpu.memory_space<vmem>>, vector<18x128xf32>
    %c0_16 = arith.constant 0 : index
    %c2_17 = arith.constant 2 : index
    %35 = memref.load %arg1[%c0_16, %c2_17] : memref<3x3xf32, #tpu.memory_space<smem>>
    %36 = vector.extract_strided_slice %34 {offsets = [0, 0], sizes = [16, 128], strides = [1, 1]} : vector<18x128xf32> to vector<16x128xf32>
    %37 = vector.broadcast %35 : f32 to vector<16x128xf32>
    %38 = arith.mulf %37, %36 : vector<16x128xf32>
    %39 = arith.addf %33, %38 : vector<16x128xf32>
    %c1_18 = arith.constant 1 : index
    %c2_19 = arith.constant 2 : index
    %40 = memref.load %arg1[%c1_18, %c2_19] : memref<3x3xf32, #tpu.memory_space<smem>>
    %41 = vector.extract_strided_slice %34 {offsets = [1, 0], sizes = [16, 128], strides = [1, 1]} : vector<18x128xf32> to vector<16x128xf32>
    %42 = vector.broadcast %40 : f32 to vector<16x128xf32>
    %43 = arith.mulf %42, %41 : vector<16x128xf32>
    %44 = arith.addf %39, %43 : vector<16x128xf32>
    %c2_20 = arith.constant 2 : index
    %c2_21 = arith.constant 2 : index
    %45 = memref.load %arg1[%c2_20, %c2_21] : memref<3x3xf32, #tpu.memory_space<smem>>
    %46 = vector.extract_strided_slice %34 {offsets = [2, 0], sizes = [16, 128], strides = [1, 1]} : vector<18x128xf32> to vector<16x128xf32>
    %47 = vector.broadcast %45 : f32 to vector<16x128xf32>
    %48 = arith.mulf %47, %46 : vector<16x128xf32>
    %49 = arith.addf %44, %48 : vector<16x128xf32>
    %c0_22 = arith.constant 0 : index
    %c0_23 = arith.constant 0 : index
    %50 = vector.load %arg3[%c0_22, %c0_23] : memref<16x128xf32, #tpu.memory_space<vmem>>, vector<16x128xf32>
    tpu.vector_store %arg3[%c0_22, %c0_23], %49 {strides = array<i32>} : memref<16x128xf32, #tpu.memory_space<vmem>>, vector<16x128xf32>,
    return
  }
}

</mosaic_0001>

<bundles_post_ra>
// kernel: tpu_custom_call.1
= control target key start
LH: loop header
LB: loop body
LE: loop exit
PB: predicated region body
PF: predicated region fallthrough
CT: control target
= control target key end

     0   :  { %9 = vsyncpa [#allocation6], 0  ;;  %s576_s0 = inlined_call_operand.<no memory space> [shape: f32[1], index: 0, kind: input, shape index: {}]   ;;  %s577_s1 = inlined_call_operand.hbm [shape: f32[3,3], index: 1, kind: input, shape index: {}]   ;;  %s578_s2 = inlined_call_operand.hbm [shape: f32[18,256], index: 2, kind: input, shape index: {}]   ;;  %s579_s3 = inlined_call_operand.hbm [shape: f32[16,128], index: 3, kind: output, shape index: {}]  }
   0x1   :  { %10 = vsyncpa [#allocation4], 0 }
   0x2   :  { %11 = vsyncpa [#allocation5], 0  ;;  %s333_s14 = scalar_lea.hbm %s577_s1, 64 }
   0x3   :  { %p334_p0 = scmp.ne.s32.totalorder %s577_s1, %s333_s14  ;;  %p337_p1 = scmp.lt.u32.totalorder %s333_s14, %s577_s1 }
   0x5   :  { %p339_p2 = pnand %p337_p1, %p334_p0 }
   0x7   :  { %342 = shalt.err (!%p339_p2)
}
   0x8   :  { %s393_s19 = smov [#allocation3]   ;;  %s394_s22 = smov [#allocation7]  }
   0x9   :  { %21 = dma.hbm_to_smem %s577_s1, 64, %s393_s19, [#allocation6]  }
   0xa   :  { %s27_s23 = sshll.u32 %s394_s22, 4  ;;  %s343_s26 = scalar_lea.hbm %s578_s2, 768  ;;  %s28_s23 = int_to_ptr.vmem [resolvable:$true] %s27_s23 }
   0xb   :  { %p344_p3 = scmp.ne.s32.totalorder %s578_s2, %s343_s26  ;;  %p347_p4 = scmp.lt.u32.totalorder %s343_s26, %s578_s2 }
   0xd   :  { %p349_p5 = pnand %p347_p4, %p344_p3 }
   0xf   :  { %352 = shalt.err (!%p349_p5)
}
  0x10   :  { %s353_s4 = scalar_lea.vmem %s28_s23, 768  ;;  %p358_p7 = scmp.lt.s32.totalorder %s28_s23, %s28_s23 }
  0x11   :  { %p354_p6 = scmp.ne.s32.totalorder %s28_s23, %s353_s4  ;;  %p359_p8 = scmp.lt.s32.totalorder %s353_s4, %s353_s4 }
  0x13   :  { %p360_p9 = por %p359_p8, %p358_p7 }
  0x15   :  { %p361_p10 = pnand %p360_p9, %p354_p6 }
  0x17   :  { %364 = shalt.err (!%p361_p10)
}
  0x18   :  { %s395_s1 = smov 256   ;;  %s396_s5 = smov 16  }
  0x19   :  { %33 = dma.hbm_to_vmem [thread:$0]  %s578_s2, 768, %s28_s23, [#allocation4], %s395_s1, %s395_s1, %s396_s5  }
  0x1a   :  { %387 = dma.done.wait [#allocation6], 64  }
  0x1b   :  { %388 = vsyncadd [#allocation6], 4294967232 }
  0x1c   :  { %389 = dma.done.wait [#allocation4], 768  }
  0x1d   :  { %390 = vsyncadd [#allocation4], 4294966528 }
  0x1e   :  { %40 = sfence }
  0x1f   :  { %s318_s8 = sld [smem:[#allocation3 + $0x1]]  ;;  %v446_v0 = vld [vmem:[#allocation7 + $0x10] sm:$0xff]  ;;  %v448_v1 = vld [vmem:[#allocation7] sm:$0xff]  ;;  %v450_v2 = vld [vmem:[#allocation7 + $0x18] sm:$0xff]  ;;  %s397_s2 = smov 127   ;;  %vm60_vm0 = vcmask 1046528   ;;  %v42_v47 = vstv %s576_s0 }
  0x20   :  { %s319_s9 = sld [smem:[#allocation3 + $0x81]]  ;;  %v452_v3 = vld [vmem:[#allocation7 + $0x8] sm:$0xff]  ;;  %v458_v8 = vld [vmem:[#allocation7 + $0x20] sm:$0x3]  ;;  %s321_s11 = sld [smem:[#allocation3 + $0x2]]  ;;  %vm78_vm1 = vcmask 1045504  }
  0x21   :  { %s320_s10 = sld [smem:[#allocation3 + $0x101]]  ;;  %v456_v7 = vld [vmem:[#allocation7 + $0x28] sm:$0x3]  ;;  %s322_s12 = sld [smem:[#allocation3 + $0x82]]  ;;  %v45_v48 = vld [vmem:[#allocation7 + $0x20] sm:$0x3] }
  0x22   :  { %s482_s13 = sld [smem:[#allocation3]]  ;;  %s499_s18 = sld [smem:[#allocation3 + $0x102]]  ;;  %vm112_vm2 = vcmask 1039360   ;;  %vm213_vm3 = vcmask 1031168  }
  0x23   :  { %s316_s14 = sld [smem:[#allocation3 + $0x80]]  ;;  %s398_s0 = smov 126  }
  0x24   :  { %s317_s15 = sld [smem:[#allocation3 + $0x100]]  ;;  %s399_s19 = smov [#allocation8]  }
  0x25   :  { %v95_v4 = vstv %s318_s8  ;;  %s303_s20 = sshll.u32 %s399_s19, 4  ;;  %s304_s20 = int_to_ptr.vmem [resolvable:$true] %s303_s20 }
  0x26   :  { %v98_v5 = vmul.f32 %v95_v4, %v446_v0  ;;  %v96_v6 = vmul.f32 %v95_v4, %v448_v1  ;;  %v99_v9 = vmul.f32 %v95_v4, %v450_v2  ;;  %v97_v10 = vmul.f32 %v95_v4, %v452_v3  ;;  %s365_s21 = scalar_lea.vmem %s304_s20, 256  ;;  %p370_p12 = scmp.lt.s32.totalorder %s304_s20, %s304_s20 }
  0x27   :  { %v120_v11 = vstv %s319_s9  ;;  %v158_v18 = vstv %s320_s10  ;;  %v196_v39 = vstv %s321_s11  ;;  %v221_v44 = vstv %s322_s12  ;;  %p366_p11 = scmp.ne.s32.totalorder %s304_s20, %s365_s21  ;;  %p371_p13 = scmp.lt.s32.totalorder %s365_s21, %s365_s21 }
  0x28   :  { %108 = vrot.lane.b32.xlu1 %v98_v5, %s397_s2  ;;  %104 = vrot.lane.b32.xlu0 %v96_v6, %s397_s2  ;;  %v122_v12 = vmul.f32 %v120_v11, %v452_v3  ;;  %v124_v13 = vmul.f32 %v120_v11, %v450_v2  ;;  %v121_v14 = vmul.f32 %v120_v11, %v448_v1  ;;  %v47_v51 = vstv %s482_s13 }
  0x29   :  { %v123_v15 = vmul.f32 %v120_v11, %v446_v0  ;;  %v126_v16 = vmul.f32 %v120_v11, %v456_v7  ;;  %v125_v17 = vmul.f32 %v120_v11, %v458_v8  ;;  %v160_v25 = vmul.f32 %v158_v18, %v452_v3  ;;  %p372_p0 = por %p371_p13, %p370_p12 }
  0x2a   :  { %v136_v19 = vrot.slane %v122_v12, 1  ;;  %v137_v20 = vrot.slane %v124_v13, 1  ;;  %v133_v21 = vrot.slane %v121_v14, 1  ;;  %v162_v26 = vmul.f32 %v158_v18, %v450_v2 }
  0x2b   :  { %v134_v22 = vrot.slane %v123_v15, 1  ;;  %v141_v23 = vrot.slane %v126_v16, 1  ;;  %v139_v24 = vrot.slane %v125_v17, 1  ;;  %v159_v29 = vmul.f32 %v158_v18, %v448_v1  ;;  %p373_p1 = pnand %p372_p0, %p366_p11 }
  0x2c   :  { %110 = vrot.lane.b32.xlu1 %v99_v9, %s397_s2  ;;  %106 = vrot.lane.b32.xlu0 %v97_v10, %s397_s2  ;;  %v138_v27 = vsel %vm60_vm0, %v136_v19, %v137_v20  ;;  %v161_v30 = vmul.f32 %v158_v18, %v446_v0  ;;  %v174_v33 = vrot.slane %v160_v25, 2  ;;  %v175_v34 = vrot.slane %v162_v26, 2 }
  0x2d   :  { %v135_v28 = vsel %vm60_vm0, %v133_v21, %v134_v22  ;;  %v142_v31 = vsel %vm60_vm0, %v137_v20, %v141_v23  ;;  %v140_v32 = vsel %vm60_vm0, %v134_v22, %v139_v24  ;;  %v171_v35 = vrot.slane %v159_v29, 2 }
  0x2e   :  { %v172_v36 = vrot.slane %v161_v30, 2  ;;  %v164_v37 = vmul.f32 %v158_v18, %v456_v7  ;;  %v163_v38 = vmul.f32 %v158_v18, %v458_v8  ;;  %v176_v40 = vsel %vm78_vm1, %v174_v33, %v175_v34 }
  0x2f   :  { %v198_v45 = vmul.f32 %v196_v39, %v452_v3  ;;  %v197_v46 = vmul.f32 %v196_v39, %v448_v1  ;;  %v200_v49 = vmul.f32 %v196_v39, %v450_v2  ;;  %v199_v50 = vmul.f32 %v196_v39, %v446_v0 }
  0x30   :  { %145 = vrot.lane.b32.xlu1 %v138_v27, %s397_s2  ;;  %143 = vrot.lane.b32.xlu0 %v135_v28, %s397_s2  ;;  %v173_v41 = vsel %vm78_vm1, %v171_v35, %v172_v36  ;;  %v179_v42 = vrot.slane %v164_v37, 2  ;;  %v177_v43 = vrot.slane %v163_v38, 2  ;;  %v53_v52 = vstv %s316_s14 }
  0x31   :  { %v223_v55 = vmul.f32 %v221_v44, %v452_v3  ;;  %v49_v56 = vmul.f32 %v446_v0, %v47_v51  ;;  %v225_v57 = vmul.f32 %v221_v44, %v450_v2  ;;  %v55_v58 = vmul.f32 %v446_v0, %v53_v52 }
  0x32   :  { %v180_v53 = vsel %vm78_vm1, %v175_v34, %v179_v42  ;;  %v178_v54 = vsel %vm78_vm1, %v172_v36, %v177_v43  ;;  %v56_v59 = vmul.f32 %v53_v52, %v45_v48  ;;  %v71_v60 = vstv %s317_s15 }
  0x33   :  { %v222_v61 = vmul.f32 %v221_v44, %v448_v1  ;;  %v51_v62 = vadd.f32 %v49_v56, %v42_v47  ;;  %v73_v63 = vmul.f32 %v446_v0, %v71_v60  ;;  %v74_v4 = vmul.f32 %v71_v60, %v45_v48 }
  0x34   :  { %149 = vrot.lane.b32.xlu1 %v142_v31, %s397_s2  ;;  %147 = vrot.lane.b32.xlu0 %v140_v32, %s397_s2  ;;  %v224_v5 = vmul.f32 %v221_v44, %v446_v0  ;;  %v62_v6 = vrot.slane %v55_v58, 1  ;;  %v64_v9 = vrot.slane %v56_v59, 1  ;;  %v48_v10 = vmul.f32 %v448_v1, %v47_v51 }
  0x35   :  { %v80_v11 = vrot.slane %v73_v63, 2  ;;  %v82_v12 = vrot.slane %v74_v4, 2  ;;  %v54_v13 = vmul.f32 %v448_v1, %v53_v52  ;;  %v72_v14 = vmul.f32 %v448_v1, %v71_v60 }
  0x36   :  { %v227_v15 = vmul.f32 %v221_v44, %v456_v7  ;;  %v226_v16 = vmul.f32 %v221_v44, %v458_v8  ;;  %v65_v17 = vsel %vm60_vm0, %v62_v6, %v64_v9  ;;  %v50_v18 = vadd.f32 %v48_v10, %v42_v47 }
  0x37   :  { %v69_v19 = vadd.f32 %v65_v17, %v51_v62  ;;  %v83_v20 = vsel %vm78_vm1, %v80_v11, %v82_v12  ;;  %v61_v21 = vrot.slane %v54_v13, 1  ;;  %v79_v22 = vrot.slane %v72_v14, 2 }
  0x38   :  { %183 = vrot.lane.b32.xlu1 %v176_v40, %s397_s2  ;;  %181 = vrot.lane.b32.xlu0 %v173_v41, %s397_s2  ;;  %v237_v23 = vrot.slane %v223_v55, 1  ;;  %v238_v24 = vrot.slane %v225_v57, 1  ;;  %v234_v25 = vrot.slane %v222_v61, 1  ;;  %v259_v26 = vstv %s499_s18 }
  0x39   :  { %v235_v27 = vrot.slane %v224_v5, 1  ;;  %v523_v28 = vadd.f32 %v83_v20, %v69_v19  ;;  %v63_v29 = vsel %vm60_vm0, %v61_v21, %v62_v6  ;;  %v81_v30 = vsel %vm78_vm1, %v79_v22, %v80_v11 }
  0x3a   :  { %v68_v31 = vadd.f32 %v63_v29, %v50_v18  ;;  %v242_v32 = vrot.slane %v227_v15, 1  ;;  %v240_v33 = vrot.slane %v226_v16, 1  ;;  %v261_v34 = vmul.f32 %v259_v26, %v452_v3 }
  0x3b   :  { %v263_v35 = vmul.f32 %v259_v26, %v450_v2  ;;  %v239_v37 = vsel %vm60_vm0, %v237_v23, %v238_v24  ;;  %v236_v38 = vsel %vm60_vm0, %v234_v25, %v235_v27  ;;  %v260_v39 = vmul.f32 %v259_v26, %v448_v1 }
  0x3c   :  { %187 = vrot.lane.b32.xlu1 %v180_v53, %s397_s2  ;;  %185 = vrot.lane.b32.xlu0 %v178_v54, %s397_s2  ;;  %v86_v36 = vadd.f32 %v81_v30, %v68_v31  ;;  %v262_v40 = vmul.f32 %v259_v26, %v446_v0  ;;  %v243_v41 = vsel %vm60_vm0, %v238_v24, %v242_v32  ;;  %v275_v3 = vrot.slane %v261_v34, 2 }
  0x3d   :  { %v241_v42 = vsel %vm60_vm0, %v235_v27, %v240_v33  ;;  %v276_v43 = vrot.slane %v263_v35, 2  ;;  %v272_v2 = vrot.slane %v260_v39, 2 }
  0x3e   :  { %v273_v44 = vrot.slane %v262_v40, 2 }
  0x3f   :  { %v277_v0 = vsel %vm78_vm1, %v275_v3, %v276_v43 }
  0x40   :  { %207 = vrot.lane.b32.xlu1 %v198_v45, %s398_s0  ;;  %205 = vrot.lane.b32.xlu0 %v197_v46, %s398_s0  ;;  %v265_v45 = vmul.f32 %v259_v26, %v456_v7  ;;  %v264_v46 = vmul.f32 %v259_v26, %v458_v8  ;;  %v274_v1 = vsel %vm78_vm1, %v272_v2, %v273_v44 }
  0x42   :  { %v280_v47 = vrot.slane %v265_v45, 2  ;;  %v278_v48 = vrot.slane %v264_v46, 2 }
  0x44   :  { %211 = vrot.lane.b32.xlu1 %v200_v49, %s398_s0  ;;  %209 = vrot.lane.b32.xlu0 %v199_v50, %s398_s0  ;;  %v281_v49 = vsel %vm78_vm1, %v276_v43, %v280_v47  ;;  %v279_v7 = vsel %vm78_vm1, %v273_v44, %v278_v48 }
  0x48   :  { %246 = vrot.lane.b32.xlu1 %v239_v37, %s398_s0  ;;  %244 = vrot.lane.b32.xlu0 %v236_v38, %s398_s0 }
  0x4c   :  { %250 = vrot.lane.b32.xlu1 %v243_v41, %s398_s0  ;;  %248 = vrot.lane.b32.xlu0 %v241_v42, %s398_s0 }
  0x50   :  { %284 = vrot.lane.b32.xlu1 %v277_v0, %s398_s0  ;;  %282 = vrot.lane.b32.xlu0 %v274_v1, %s398_s0 }
  0x54   :  { %288 = vrot.lane.b32.xlu1 %v281_v49, %s398_s0  ;;  %286 = vrot.lane.b32.xlu0 %v279_v7, %s398_s0 }
  0x9a   :  { %v109_v8 = vpop.permute.xlu1 %108  ;;  %v105_v50 = vpop.permute.xlu0 %104 }
  0x9e   :  { %v111_v51 = vpop.permute.xlu1 %110  ;;  %v107_v52 = vpop.permute.xlu0 %106 }
  0x9f   :  { %v113_v5 = vsel %vm112_vm2, %v105_v50, %v107_v52  ;;  %v114_v12 = vsel %vm112_vm2, %v109_v8, %v111_v51 }
  0xa0   :  { %v117_v9 = vadd.f32 %v113_v5, %v86_v36  ;;  %v118_v17 = vadd.f32 %v114_v12, %v523_v28 }
  0xa2   :  { %v146_v53 = vpop.permute.xlu1 %145  ;;  %v144_v54 = vpop.permute.xlu0 %143 }
  0xa3   :  { %v151_v6 = vsel %vm112_vm2, %v144_v54, %v146_v53 }
  0xa4   :  { %v155_v14 = vadd.f32 %v151_v6, %v117_v9 }
  0xa6   :  { %v150_v55 = vpop.permute.xlu1 %149  ;;  %v148_v56 = vpop.permute.xlu0 %147 }
  0xa7   :  { %v152_v15 = vsel %vm112_vm2, %v148_v56, %v150_v55 }
  0xa8   :  { %v156_v23 = vadd.f32 %v152_v15, %v118_v17 }
  0xaa   :  { %v184_v57 = vpop.permute.xlu1 %183  ;;  %v182_v58 = vpop.permute.xlu0 %181 }
  0xab   :  { %v189_v13 = vsel %vm112_vm2, %v182_v58, %v184_v57 }
  0xac   :  { %v193_v18 = vadd.f32 %v189_v13, %v155_v14 }
  0xae   :  { %v188_v59 = vpop.permute.xlu1 %187  ;;  %v186_v60 = vpop.permute.xlu0 %185 }
  0xaf   :  { %v190_v21 = vsel %vm112_vm2, %v186_v60, %v188_v59 }
  0xb0   :  { %v194_v26 = vadd.f32 %v190_v21, %v156_v23 }
  0xb2   :  { %v208_v61 = vpop.permute.xlu1 %207  ;;  %v206_v62 = vpop.permute.xlu0 %205 }
  0xb3   :  { %v214_v16 = vsel %vm213_vm3, %v206_v62, %v208_v61 }
  0xb4   :  { %v218_v24 = vadd.f32 %v214_v16, %v193_v18 }
  0xb6   :  { %v212_v63 = vpop.permute.xlu1 %211  ;;  %v210_v4 = vpop.permute.xlu0 %209 }
  0xb7   :  { %v215_v25 = vsel %vm213_vm3, %v210_v4, %v212_v63 }
  0xb8   :  { %v219_v28 = vadd.f32 %v215_v25, %v194_v26 }
  0xba   :  { %v247_v10 = vpop.permute.xlu1 %246  ;;  %v245_v11 = vpop.permute.xlu0 %244 }
  0xbb   :  { %v252_v22 = vsel %vm213_vm3, %v245_v11, %v247_v10 }
  0xbc   :  { %v256_v27 = vadd.f32 %v252_v22, %v218_v24 }
  0xbe   :  { %v251_v19 = vpop.permute.xlu1 %250  ;;  %v249_v20 = vpop.permute.xlu0 %248 }
  0xbf   :  { %v253_v31 = vsel %vm213_vm3, %v249_v20, %v251_v19 }
  0xc0   :  { %v257_v34 = vadd.f32 %v253_v31, %v219_v28 }
  0xc2   :  { %v285_v29 = vpop.permute.xlu1 %284  ;;  %v283_v30 = vpop.permute.xlu0 %282 }
  0xc3   :  { %v290_v32 = vsel %vm213_vm3, %v283_v30, %v285_v29 }
  0xc4   :  { %v294_v33 = vadd.f32 %v290_v32, %v256_v27 }
  0xc6   :  { %296 = vst [vmem:[#allocation8] sm:$0xff] %v294_v33  ;;  %v289_v35 = vpop.permute.xlu1 %288  ;;  %v287_v36 = vpop.permute.xlu0 %286 }
  0xc7   :  { %v291_v37 = vsel %vm213_vm3, %v287_v36, %v289_v35 }
  0xc8   :  { %v295_v38 = vadd.f32 %v291_v37, %v257_v34 }
  0xca   :  { %297 = vst [vmem:[#allocation8 + $0x8] sm:$0xff] %v295_v38 }
  0xcb   :  { %376 = shalt.err (!%p373_p1)
}
  0xcc   :  { %s377_s24 = scalar_lea.hbm %s579_s3, 256 }
  0xcd   :  { %p378_p2 = scmp.ne.s32.totalorder %s579_s3, %s377_s24  ;;  %p381_p3 = scmp.lt.u32.totalorder %s377_s24, %s579_s3 }
  0xcf   :  { %p383_p4 = pnand %p381_p3, %p378_p2 }
  0xd1   :  { %386 = shalt.err (!%p383_p4)
}
  0xd2   :  { %s400_s29 = smov 128   ;;  %s401_s30 = smov 8  }
  0xd3   :  { %309 = dma.vmem_to_hbm [thread:$0]  %s304_s20, 256, %s579_s3, [#allocation5], %s400_s29, %s400_s29, %s401_s30  }
  0xd4   :  { %391 = dma.done.wait [#allocation5], 256  }
  0xd5   :  { %392 = vsyncadd [#allocation5], 4294967040 }
  0xd6   :  { %313 = vsyncpa [#allocation4], 1 }
  0xd7   :  { %314 = vsyncpa [#allocation5], 1 }
  0xd8   :  { %315 = vsyncpa [#allocation6], 1 }

</bundles_post_ra>
